<compile_context>
chip_gen: v5e
topology: v5e:2x2
jax: 0.10.0
libtpu: 0.0.40
codegen_flags: <defaults>
</compile_context>

<pallas_src>
import math

import jax
import jax.numpy as jnp
from jax.experimental import pallas as pl
from jax.experimental.pallas import tpu as pltpu

BN_EPS = 1e-5


def mlp_kernel(x_ref, *refs):
    """refs = (w_0, b_0, w_1, b_1, ..., out_ref).

    x_ref : (1, C_in, TN)            input tile (points on lanes)
    w_l   : (C_out_l, C_in_l) bf16   BN-folded conv weight
    b_l   : (C_out_l, 1)      f32    BN-folded bias
    out   : (1, C_last, TN)
    """
    out_ref = refs[-1]
    wb_refs = refs[:-1]
    n_layers = len(wb_refs) // 2

    h = x_ref[0].astype(jnp.float32)                        # (C_in, TN)
    for l in range(n_layers):
        w = wb_refs[2 * l][...]                             # (C_out, C_in) bf16
        b = wb_refs[2 * l + 1][...]                         # (C_out, 1)    f32
        y = jnp.dot(w, h.astype(jnp.bfloat16),
                    preferred_element_type=jnp.float32)     # MXU, f32 accum
        h = jnp.maximum(y + b, 0.0)                         # bias + ReLU in f32
    out_ref[0] = h.astype(out_ref.dtype)


def mlp_forward(x, folded_weights, folded_biases, *, tile_n=128):
    """x: [B, C_in, N] f32.  folded_weights[l]: (C_out_l, C_in_l) bf16,
    folded_biases[l]: (C_out_l, 1) f32 (BatchNorm already folded in)."""
    B, c_in, N = x.shape
    c_out = folded_weights[-1].shape[0]

    # Points dim on lanes, tiled in 128-wide chunks (lane-dense output stores).
    tn = tile_n if N >= tile_n else N
    pad = (-N) % tn
    if pad:
        # zero-pad extra points; 1x1 conv does not mix points, sliced off below.
        x = jnp.pad(x, ((0, 0), (0, 0), (0, pad)))
    n_padded = N + pad
    n_tiles = n_padded // tn

    # Explicit VMEM budget: weights (x2 worst case) + double-buffered x/out
    # tiles + per-layer intermediates, with headroom.
    weight_bytes = sum(int(w.size) * w.dtype.itemsize + int(b.size) * b.dtype.itemsize
                       for w, b in zip(folded_weights, folded_biases))
    act_bytes = 2 * (c_in + c_out) * tn * 4
    inter_bytes = 2 * sum(w.shape[0] * tn * 4 for w in folded_weights)
    vmem_limit = max(2 * weight_bytes + act_bytes + inter_bytes + (4 << 20), 8 << 20)
    vmem_limit = min(vmem_limit, 48 << 20)

    def build_call(single_buffer_weights):
        def invariant_spec(shape):
            # Grid-invariant operand: same block every step.
            if single_buffer_weights:
                return pl.BlockSpec(shape, lambda b, n: (0,) * len(shape),
                                    pipeline_mode=pl.Buffered(1))
            return pl.BlockSpec(shape, lambda b, n: (0,) * len(shape))

        in_specs = [pl.BlockSpec((1, c_in, tn), lambda b, n: (b, 0, n))]
        args = [x]
        for w, bvec in zip(folded_weights, folded_biases):
            in_specs.append(invariant_spec(w.shape))
            in_specs.append(invariant_spec(bvec.shape))
            args.append(w)
            args.append(bvec)

        grid_spec = pltpu.PrefetchScalarGridSpec(
            num_scalar_prefetch=0,
            grid=(B, n_tiles),
            in_specs=in_specs,
            out_specs=pl.BlockSpec((1, c_out, tn), lambda b, n: (b, 0, n)),
        )
        call = pl.pallas_call(
            mlp_kernel,
            out_shape=jax.ShapeDtypeStruct((B, c_out, n_padded), jnp.float32),
            grid_spec=grid_spec,
            compiler_params=pltpu.CompilerParams(
                dimension_semantics=("parallel", "parallel"),
                vmem_limit_bytes=int(vmem_limit),
            ),
        )
        return call, args

    try:
        call, args = build_call(True)     # single-buffer grid-invariant weights
        out = jax.block_until_ready(call(*args))
    except Exception:
        # Fallback if this JAX build rejects pl.Buffered(1) on TPU block specs.
        call, args = build_call(False)
        out = jax.block_until_ready(call(*args))

    return out[:, :, :N]


# ---------------------------------------------------------------------------
# Parameter construction / BatchNorm folding / pure-JAX reference
# ---------------------------------------------------------------------------

def init_mlp_params(key, c_in, layer_channels):
    """PyTorch-style shapes: Conv1d(k=1) weight (out, in), bias (out,);
    BatchNorm1d gamma/beta and (non-trivial) running stats for eval mode."""
    params = []
    last = c_in
    for c_out in layer_channels:
        key, kw, kb, km, kv = jax.random.split(key, 5)
        bound = 1.0 / math.sqrt(last)
        w = jax.random.uniform(kw, (c_out, last), jnp.float32, -bound, bound)
        b = jax.random.uniform(kb, (c_out,), jnp.float32, -bound, bound)
        params.append(dict(
            w=w, b=b,
            gamma=jnp.ones((c_out,), jnp.float32),
            beta=jnp.zeros((c_out,), jnp.float32),
            # random running stats so the BN folding is actually exercised
            mean=0.1 * jax.random.normal(km, (c_out,), jnp.float32),
            var=jax.random.uniform(kv, (c_out,), jnp.float32, 0.5, 1.5),
        ))
        last = c_out
    return params


def fold_bn(params):
    """Fold eval-mode BatchNorm into the 1x1-conv weights/biases.
    Weights are stored bf16 (MXU operands); biases stay f32."""
    ws, bs = [], []
    for p in params:
        scale = p["gamma"] / jnp.sqrt(p["var"] + BN_EPS)            # (C_out,)
        w_f = (p["w"] * scale[:, None]).astype(jnp.bfloat16)        # (C_out, C_in)
        b_f = (scale * (p["b"] - p["mean"]) + p["beta"])[:, None]   # (C_out, 1)
        ws.append(w_f)
        bs.append(b_f.astype(jnp.float32))
    return ws, bs


def _reference(x, params):
    """Unfused f32 reference: Conv1d(k=1) -> eval-mode BatchNorm1d -> ReLU."""
    h = x
    for p in params:
        y = jnp.einsum("oc,bcn->bon", p["w"], h) + p["b"][None, :, None]
        y = (y - p["mean"][None, :, None]) * jax.lax.rsqrt(p["var"][None, :, None] + BN_EPS)
        y = y * p["gamma"][None, :, None] + p["beta"][None, :, None]
        h = jnp.maximum(y, 0.0)
    return h


if __name__ == "__main__":
    # MLPNet(3, [32, 64], b_shared=True) on a small point cloud: [B, C_in, N]
    B, C_IN, N = 2, 3, 256
    LAYERS = [32, 64]

    key = jax.random.PRNGKey(0)
    kx, kp = jax.random.split(key)
    x = jax.random.normal(kx, (B, C_IN, N), jnp.float32)

    params = init_mlp_params(kp, C_IN, LAYERS)
    folded_w, folded_b = fold_bn(params)

    out = mlp_forward(x, folded_w, folded_b)
    out = jax.block_until_ready(out)

    ref = _reference(x, params)
    assert out.shape == (B, LAYERS[-1], N), out.shape
    max_err = float(jnp.max(jnp.abs(out - ref)))
    # bf16 matmul operands (f32 accumulation) -> loosened tolerance vs f32 ref.
    assert jnp.allclose(out, ref, atol=5e-2, rtol=5e-2), f"max abs err {max_err}"
    print("KERNEL_OK")
</pallas_src>

<mosaic_0001>
module attributes {stable_mosaic.version = 11 : i64} {
  func.func @mlp_kernel(%arg0: i32, %arg1: i32, %arg2: memref<1x3x128xf32, #tpu.memory_space<vmem>>, %arg3: memref<32x3xbf16, #tpu.memory_space<vmem>>, %arg4: memref<32x1xf32, #tpu.memory_space<vmem>>, %arg5: memref<64x32xbf16, #tpu.memory_space<vmem>>, %arg6: memref<64x1xf32, #tpu.memory_space<vmem>>, %arg7: memref<1x64x128xf32, #tpu.memory_space<vmem>>) attributes {dimension_semantics = [#tpu.dimension_semantics<parallel>, #tpu.dimension_semantics<parallel>], iteration_bounds = array<i64: 2, 2>, scalar_prefetch = 0 : i64, scratch_operands = 0 : i64, tpu.core_type = #tpu.core_type<tc>, window_params = [{transform_indices = @transform_0, window_bounds = array<i64: 1, 3, 128>}, {pipeline_mode = #tpu.pipeline_mode<synchronous>, transform_indices = @transform_1, window_bounds = array<i64: 32, 3>}, {pipeline_mode = #tpu.pipeline_mode<synchronous>, transform_indices = @transform_2, window_bounds = array<i64: 32, 1>}, {pipeline_mode = #tpu.pipeline_mode<synchronous>, transform_indices = @transform_3, window_bounds = array<i64: 64, 32>}, {pipeline_mode = #tpu.pipeline_mode<synchronous>, transform_indices = @transform_4, window_bounds = array<i64: 64, 1>}, {transform_indices = @transform_5, window_bounds = array<i64: 1, 64, 128>}]} {
    %c0 = arith.constant 0 : index
    %c0_0 = arith.constant 0 : index
    %c0_1 = arith.constant 0 : index
    %0 = vector.load %arg2[%c0, %c0_0, %c0_1] : memref<1x3x128xf32, #tpu.memory_space<vmem>>, vector<1x3x128xf32>
    %1 = vector.shape_cast %0 : vector<1x3x128xf32> to vector<3x128xf32>
    %c0_2 = arith.constant 0 : index
    %c0_3 = arith.constant 0 : index
    %2 = vector.load %arg3[%c0_2, %c0_3] : memref<32x3xbf16, #tpu.memory_space<vmem>>, vector<32x3xbf16>
    %c0_4 = arith.constant 0 : index
    %c0_5 = arith.constant 0 : index
    %3 = vector.load %arg4[%c0_4, %c0_5] : memref<32x1xf32, #tpu.memory_space<vmem>>, vector<32x1xf32>
    %4 = arith.truncf %1 : vector<3x128xf32> to vector<3x128xbf16>
    %cst = arith.constant dense<0.000000e+00> : vector<32x128xf32>
    %5 = tpu.matmul %2, %4, %cst {dimension_numbers = #tpu.dot_dimension_numbers<[1], [0], [0], [1], [0, 0, 1, 1], [], []>} : vector<32x3xbf16>, vector<3x128xbf16>, vector<32x128xf32> -> vector<32x128xf32>
    %6 = vector.broadcast %3 : vector<32x1xf32> to vector<32x128xf32>
    %7 = arith.addf %5, %6 : vector<32x128xf32>
    %cst_6 = arith.constant 0.000000e+00 : f32
    %8 = vector.broadcast %cst_6 : f32 to vector<32x128xf32>
    %9 = arith.maximumf %7, %8 : vector<32x128xf32>
    %c0_7 = arith.constant 0 : index
    %c0_8 = arith.constant 0 : index
    %10 = vector.load %arg5[%c0_7, %c0_8] : memref<64x32xbf16, #tpu.memory_space<vmem>>, vector<64x32xbf16>
    %c0_9 = arith.constant 0 : index
    %c0_10 = arith.constant 0 : index
    %11 = vector.load %arg6[%c0_9, %c0_10] : memref<64x1xf32, #tpu.memory_space<vmem>>, vector<64x1xf32>
    %12 = arith.truncf %9 : vector<32x128xf32> to vector<32x128xbf16>
    %cst_11 = arith.constant dense<0.000000e+00> : vector<64x128xf32>
    %13 = tpu.matmul %10, %12, %cst_11 {dimension_numbers = #tpu.dot_dimension_numbers<[1], [0], [0], [1], [0, 0, 1, 1], [], []>} : vector<64x32xbf16>, vector<32x128xbf16>, vector<64x128xf32> -> vector<64x128xf32>
    %14 = vector.broadcast %11 : vector<64x1xf32> to vector<64x128xf32>
    %15 = arith.addf %13, %14 : vector<64x128xf32>
    %cst_12 = arith.constant 0.000000e+00 : f32
    %16 = vector.broadcast %cst_12 : f32 to vector<64x128xf32>
    %17 = arith.maximumf %15, %16 : vector<64x128xf32>
    %c0_13 = arith.constant 0 : index
    %c0_14 = arith.constant 0 : index
    %c0_15 = arith.constant 0 : index
    %18 = vector.load %arg7[%c0_13, %c0_14, %c0_15] : memref<1x64x128xf32, #tpu.memory_space<vmem>>, vector<1x64x128xf32>
    %19 = vector.shape_cast %18 : vector<1x64x128xf32> to vector<64x128xf32>
    %20 = vector.shape_cast %17 : vector<64x128xf32> to vector<1x64x128xf32>
    tpu.vector_store %arg7[%c0_13, %c0_14, %c0_15], %20 {strides = array<i32>} : memref<1x64x128xf32, #tpu.memory_space<vmem>>, vector<1x64x128xf32>,
    return
  }
  func.func @transform_0(%arg0: i32, %arg1: i32) -> (i32, i32, i32) {
    %c0_i32 = arith.constant 0 : i32
    %c0_i32_0 = arith.constant 0 : i32
    return %arg0, %c0_i32, %arg1 : i32, i32, i32
  }
  func.func @transform_1(%arg0: i32, %arg1: i32) -> (i32, i32) {
    %c0_i32 = arith.constant 0 : i32
    %c0_i32_0 = arith.constant 0 : i32
    %c0_i32_1 = arith.constant 0 : i32
    return %c0_i32, %c0_i32_0 : i32, i32
  }
  func.func @transform_2(%arg0: i32, %arg1: i32) -> (i32, i32) {
    %c0_i32 = arith.constant 0 : i32
    %c0_i32_0 = arith.constant 0 : i32
    %c0_i32_1 = arith.constant 0 : i32
    return %c0_i32, %c0_i32_0 : i32, i32
  }
  func.func @transform_3(%arg0: i32, %arg1: i32) -> (i32, i32) {
    %c0_i32 = arith.constant 0 : i32
    %c0_i32_0 = arith.constant 0 : i32
    %c0_i32_1 = arith.constant 0 : i32
    return %c0_i32, %c0_i32_0 : i32, i32
  }
  func.func @transform_4(%arg0: i32, %arg1: i32) -> (i32, i32) {
    %c0_i32 = arith.constant 0 : i32
    %c0_i32_0 = arith.constant 0 : i32
    %c0_i32_1 = arith.constant 0 : i32
    return %c0_i32, %c0_i32_0 : i32, i32
  }
  func.func @transform_5(%arg0: i32, %arg1: i32) -> (i32, i32, i32) {
    %c0_i32 = arith.constant 0 : i32
    %c0_i32_0 = arith.constant 0 : i32
    return %arg0, %c0_i32, %arg1 : i32, i32, i32
  }
}

module attributes {stable_mosaic.version = 11 : i64} {
  func.func @mlp_kernel(%arg0: i32, %arg1: i32, %arg2: memref<1x3x128xf32, #tpu.memory_space<vmem>>, %arg3: memref<32x3xbf16, #tpu.memory_space<vmem>>, %arg4: memref<32x1xf32, #tpu.memory_space<vmem>>, %arg5: memref<64x32xbf16, #tpu.memory_space<vmem>>, %arg6: memref<64x1xf32, #tpu.memory_space<vmem>>, %arg7: memref<1x64x128xf32, #tpu.memory_space<vmem>>) attributes {dimension_semantics = [#tpu.dimension_semantics<parallel>, #tpu.dimension_semantics<parallel>], iteration_bounds = array<i64: 2, 2>, scalar_prefetch = 0 : i64, scratch_operands = 0 : i64, tpu.core_type = #tpu.core_type<tc>, window_params = [{transform_indices = @transform_0, window_bounds = array<i64: 1, 3, 128>}, {pipeline_mode = #tpu.pipeline_mode<synchronous>, transform_indices = @transform_1, window_bounds = array<i64: 32, 3>}, {pipeline_mode = #tpu.pipeline_mode<synchronous>, transform_indices = @transform_2, window_bounds = array<i64: 32, 1>}, {pipeline_mode = #tpu.pipeline_mode<synchronous>, transform_indices = @transform_3, window_bounds = array<i64: 64, 32>}, {pipeline_mode = #tpu.pipeline_mode<synchronous>, transform_indices = @transform_4, window_bounds = array<i64: 64, 1>}, {transform_indices = @transform_5, window_bounds = array<i64: 1, 64, 128>}]} {
    %c0 = arith.constant 0 : index
    %c0_0 = arith.constant 0 : index
    %c0_1 = arith.constant 0 : index
    %0 = vector.load %arg2[%c0, %c0_0, %c0_1] : memref<1x3x128xf32, #tpu.memory_space<vmem>>, vector<1x3x128xf32>
    %1 = vector.shape_cast %0 : vector<1x3x128xf32> to vector<3x128xf32>
    %c0_2 = arith.constant 0 : index
    %c0_3 = arith.constant 0 : index
    %2 = vector.load %arg3[%c0_2, %c0_3] : memref<32x3xbf16, #tpu.memory_space<vmem>>, vector<32x3xbf16>
    %c0_4 = arith.constant 0 : index
    %c0_5 = arith.constant 0 : index
    %3 = vector.load %arg4[%c0_4, %c0_5] : memref<32x1xf32, #tpu.memory_space<vmem>>, vector<32x1xf32>
    %4 = arith.truncf %1 : vector<3x128xf32> to vector<3x128xbf16>
    %cst = arith.constant dense<0.000000e+00> : vector<32x128xf32>
    %5 = tpu.matmul %2, %4, %cst {dimension_numbers = #tpu.dot_dimension_numbers<[1], [0], [0], [1], [0, 0, 1, 1], [], []>} : vector<32x3xbf16>, vector<3x128xbf16>, vector<32x128xf32> -> vector<32x128xf32>
    %6 = vector.broadcast %3 : vector<32x1xf32> to vector<32x128xf32>
    %7 = arith.addf %5, %6 : vector<32x128xf32>
    %cst_6 = arith.constant 0.000000e+00 : f32
    %8 = vector.broadcast %cst_6 : f32 to vector<32x128xf32>
    %9 = arith.maximumf %7, %8 : vector<32x128xf32>
    %c0_7 = arith.constant 0 : index
    %c0_8 = arith.constant 0 : index
    %10 = vector.load %arg5[%c0_7, %c0_8] : memref<64x32xbf16, #tpu.memory_space<vmem>>, vector<64x32xbf16>
    %c0_9 = arith.constant 0 : index
    %c0_10 = arith.constant 0 : index
    %11 = vector.load %arg6[%c0_9, %c0_10] : memref<64x1xf32, #tpu.memory_space<vmem>>, vector<64x1xf32>
    %12 = arith.truncf %9 : vector<32x128xf32> to vector<32x128xbf16>
    %cst_11 = arith.constant dense<0.000000e+00> : vector<64x128xf32>
    %13 = tpu.matmul %10, %12, %cst_11 {dimension_numbers = #tpu.dot_dimension_numbers<[1], [0], [0], [1], [0, 0, 1, 1], [], []>} : vector<64x32xbf16>, vector<32x128xbf16>, vector<64x128xf32> -> vector<64x128xf32>
    %14 = vector.broadcast %11 : vector<64x1xf32> to vector<64x128xf32>
    %15 = arith.addf %13, %14 : vector<64x128xf32>
    %cst_12 = arith.constant 0.000000e+00 : f32
    %16 = vector.broadcast %cst_12 : f32 to vector<64x128xf32>
    %17 = arith.maximumf %15, %16 : vector<64x128xf32>
    %c0_13 = arith.constant 0 : index
    %c0_14 = arith.constant 0 : index
    %c0_15 = arith.constant 0 : index
    %18 = vector.load %arg7[%c0_13, %c0_14, %c0_15] : memref<1x64x128xf32, #tpu.memory_space<vmem>>, vector<1x64x128xf32>
    %19 = vector.shape_cast %18 : vector<1x64x128xf32> to vector<64x128xf32>
    %20 = vector.shape_cast %17 : vector<64x128xf32> to vector<1x64x128xf32>
    tpu.vector_store %arg7[%c0_13, %c0_14, %c0_15], %20 {strides = array<i32>} : memref<1x64x128xf32, #tpu.memory_space<vmem>>, vector<1x64x128xf32>,
    return
  }
  func.func @transform_0(%arg0: i32, %arg1: i32) -> (i32, i32, i32) {
    %c0_i32 = arith.constant 0 : i32
    %c0_i32_0 = arith.constant 0 : i32
    return %arg0, %c0_i32, %arg1 : i32, i32, i32
  }
  func.func @transform_1(%arg0: i32, %arg1: i32) -> (i32, i32) {
    %c0_i32 = arith.constant 0 : i32
    %c0_i32_0 = arith.constant 0 : i32
    %c0_i32_1 = arith.constant 0 : i32
    return %c0_i32, %c0_i32_0 : i32, i32
  }
  func.func @transform_2(%arg0: i32, %arg1: i32) -> (i32, i32) {
    %c0_i32 = arith.constant 0 : i32
    %c0_i32_0 = arith.constant 0 : i32
    %c0_i32_1 = arith.constant 0 : i32
    return %c0_i32, %c0_i32_0 : i32, i32
  }
  func.func @transform_3(%arg0: i32, %arg1: i32) -> (i32, i32) {
    %c0_i32 = arith.constant 0 : i32
    %c0_i32_0 = arith.constant 0 : i32
    %c0_i32_1 = arith.constant 0 : i32
    return %c0_i32, %c0_i32_0 : i32, i32
  }
  func.func @transform_4(%arg0: i32, %arg1: i32) -> (i32, i32) {
    %c0_i32 = arith.constant 0 : i32
    %c0_i32_0 = arith.constant 0 : i32
    %c0_i32_1 = arith.constant 0 : i32
    return %c0_i32, %c0_i32_0 : i32, i32
  }
  func.func @transform_5(%arg0: i32, %arg1: i32) -> (i32, i32, i32) {
    %c0_i32 = arith.constant 0 : i32
    %c0_i32_0 = arith.constant 0 : i32
    return %arg0, %c0_i32, %arg1 : i32, i32, i32
  }
}

</mosaic_0001>

<bundles_post_ra>
// kernel: tpu_custom_call.1
= control target key start
LH: loop header
LB: loop body
LE: loop exit
PB: predicated region body
PF: predicated region fallthrough
CT: control target
= control target key end

     0   :  { %10 = vsyncpa [#allocation3], 0  ;;  %s1014_s0 = inlined_call_operand.vmem [shape: f32[2,3,256], index: 0, kind: input, shape index: {}]   ;;  %s1015_s1 = inlined_call_operand.vmem [shape: bf16[32,3], index: 1, kind: input, shape index: {}]   ;;  %s1016_s2 = inlined_call_operand.vmem [shape: f32[32,1], index: 2, kind: input, shape index: {}]   ;;  %s1017_s3 = inlined_call_operand.vmem [shape: bf16[64,32], index: 3, kind: input, shape index: {}]   ;;  %s1018_s4 = inlined_call_operand.vmem [shape: f32[64,1], index: 4, kind: input, shape index: {}]   ;;  %s1019_s5 = inlined_call_operand.hbm [shape: f32[2,64,256], index: 5, kind: output, shape index: {}]  }
   0x1   :  { %12 = vsyncpa [#allocation3 + $0x1], 0  ;;  %s823_s18 = smov 0   ;;  %s825_s19 = smov 0  }
   0x2   :  { %s827_s20 = smov 0   ;;  %s829_s21 = smov 0  }
   0x3   :  { %s831_s22 = smov 0   ;;  %s833_s23 = smov 0  }
   0x4   :  { %s835_s24 = smov 0   ;;  %s837_s25 = smov 0  }
   0x5 LB: > { %s560_s26 = sadd.s32 4294967295, %s786_s25   ;;  %s561_s27 = sadd.s32 4294967294, %s786_s25   ;;  %s786_s25 = sphi %s837_s25, %s18_s25   ;;  %s782_s24 = sphi %s835_s24, %s1028_s24   ;;  %s778_s23 = sphi %s833_s23, %s1027_s23   ;;  %s774_s22 = sphi %s831_s22, %s1026_s22   ;;  %s770_s21 = sphi %s829_s21, %s1025_s21   ;;  %s766_s20 = sphi %s827_s20, %s1024_s20   ;;  %s762_s19 = sphi %s825_s19, %s1023_s19   ;;  %s758_s18 = sphi %s823_s18, %s1022_s18  }
   0x6   : > { %s27_s28 = sadd.s32 1, %s778_s23  ;;  %s30_s29 = sadd.s32 1, %s782_s24 }
   0x7   : > { %p28_p0 = scmp.ge.s32.totalorder %s27_s28, 2  ;;  %p161_p1 = scmp.ne.s32.totalorder %s766_s20, %s762_s19 }
   0x8   : > { %p162_p2 = scmp.eq.s32.totalorder %s560_s26, 3  ;;  %p167_p5 = scmp.ne.s32.totalorder %s762_s19, %s758_s18 }
   0x9   : > { %s1030_s28 = smov (%p28_p0, %s27_s28), 0  ;;  %s1032_s29 = smov (!%p28_p0, %s30_s29), %s782_s24 }
   0xa   : > { %s147_s30 = ssub.s32 %s778_s23, %s1030_s28  ;;  %p874_p3 = por %p162_p2, %p161_p1 }
   0xb   : > { %p32_p4 = scmp.ge.s32.totalorder %s1032_s29, 2  ;;  %p168_p6 = scmp.eq.s32.totalorder %s561_s27, 3 }
   0xc   : > { %p564_p7 = scmp.ge.s32.totalorder %s786_s25, 1  ;;  %p209_p9 = scmp.lt.s32.totalorder %s786_s25, 5 }
   0xd   : > { %s1034_s29 = smov (%p32_p4, %s1032_s29), 0  ;;  %p883_p8 = por %p168_p6, %p167_p5 }
   0xe   : > { %s146_s8 = ssub.s32 %s782_s24, %s1034_s29  ;;  %s151_s9 = sadd.s32 1, %s766_s20 }
   0xf   : > { %s148_s10 = sor.u32 %s147_s30, %s146_s8  ;;  %p210_p10 = pnand %p564_p7, %p209_p9 }
  0x10   : > { %p149_p11 = scmp.eq.s32.totalorder %s148_s10, 0  ;;  %p240_p12 = scmp.lt.s32.totalorder (!%p210_p10), %s774_s22, 1 }
  0x11   : > { %213 = sbr.rel (%p210_p10) target bundleno = 364 (0x16c), region = 40  ;;  %p242_p13 = scmp.lt.s32.totalorder (!%p210_p10), %s770_s21, 1 }
  0x12   : > { %s892_s11 = scalar_select %p149_p11, %s766_s20, %s151_s9  }
  0x16   : > { %v256_v0 = vld [vmem:[%s1016_s2 + $0x10] sm:$0xff]  ;;  %v254_v1 = vld [vmem:[%s1016_s2] sm:$0xff]  ;;  %s241_s16 = scalar_select %p240_p12, %s774_s22, 1  ;;  %vm296_vm0 = vcmask 1040384   ;;  %v788_v2 = vmov 0   ;;  %vm297_vm1 = vcmask 1041408  }
  0x17   : > { %689 = vset.pattern.permute.xlu0 %v788_v2  ;;  %690 = vset.pattern.permute.xlu1 %v788_v2  ;;  %s243_s17 = scalar_select %p242_p13, %s770_s21, 1  ;;  %v789_v3 = vmov 65535   ;;  %v257_v7 = vld [vmem:[%s1016_s2 + $0x18] sm:$0xff]  ;;  %v255_v8 = vld [vmem:[%s1016_s2 + $0x8] sm:$0xff]  ;;  %v603_v11 = vld [vmem:[%s1015_s1] sm:$0xff]  ;;  %vm289_vm2 = vcmask 23552  }
  0x18   : > { %271 = vperm.xlu0 %689, %v256_v0   ;;  %261 = vperm.xlu1 %690, %v254_v1   ;;  %s566_s26 = sshll.u32 %s241_s16, 1  ;;  %v298_v4 = vsel %vm296_vm0, 4294967295, %v789_v3  ;;  %v336_v12 = vld [vmem:[%s1018_s4 + $0x10] sm:$0xff]  ;;  %v337_v13 = vld [vmem:[%s1018_s4 + $0x18] sm:$0xff]  ;;  %v339_v14 = vld [vmem:[%s1018_s4 + $0x28] sm:$0xff]  ;;  %vm404_vm3 = vcmask 261120  }
  0x19   : > { %691 = vset.pattern.permute.xlu2 %v788_v2  ;;  %s245_s27 = sadd.s32 %s566_s26, %s243_s17  ;;  %v299_v6 = vsel %vm297_vm1, %v298_v4, 0  ;;  %v340_v15 = vld [vmem:[%s1018_s4 + $0x30] sm:$0xff]  ;;  %v604_v16 = vld [vmem:[%s1015_s1 + $0x8] sm:$0xff]  ;;  %v334_v22 = vld [vmem:[%s1018_s4] sm:$0xff] }
  0x1a   : > { %s567_s30 = sshll.u32 %s245_s27, 2  ;;  %346 = vperm.xlu2 %691, %v334_v22   ;;  %v335_v34 = vld [vmem:[%s1018_s4 + $0x8] sm:$0xff]  ;;  %v605_v37 = vld [vmem:[%s1017_s3] sm:$0xff]  ;;  %v608_v39 = vld [vmem:[%s1017_s3 + $0x18] sm:$0xff] }
  0x1b   : > { %s247_s10 = scalar_lea.vmem %s1014_s0, %s567_s30  ;;  %v606_v38 = vld [vmem:[%s1017_s3 + $0x8] sm:$0xff]  ;;  %v338_v40 = vld [vmem:[%s1018_s4 + $0x20] sm:$0xff]  ;;  %v341_v41 = vld [vmem:[%s1018_s4 + $0x38] sm:$0xff]  ;;  %s237_s30 = sand.u32 1, %s762_s19  }
  0x1c   : > { %v249_v5 = vld [vmem:[%s247_s10] sm:$0x7]  ;;  %v607_v42 = vld [vmem:[%s1017_s3 + $0x10] sm:$0xff]  ;;  %s565_s8 = sshll.u32 %s237_s30, 6  ;;  %s599_s10 = sshll.u32 %s774_s22, 4 }
  0x1d   : > { %v258_v9 = vpack.c.bf16 %v249_v5, %v249_v5  ;;  %s958_s9 = scalar_lea.vmem [#allocation2], %s565_s8  ;;  %s473_s12 = sadd.s32 %s770_s21, %s599_s10 }
  0x1e   : > { %s600_s13 = sshll.u32 %s473_s12, 3  ;;  %s476_s17 = sshll.u32 %s958_s9, 4  ;;  %s477_s17 = int_to_ptr.vmem [resolvable:$true] %s476_s17 }
  0x1f   : > { %v301_v10 = vand.u32 %v299_v6, %v258_v9  ;;  %s475_s16 = scalar_lea.hbm %s1019_s5, %s600_s13  ;;  %s463_s21 = scalar_lea.sflag [#allocation3], %s237_s30 }
  0x20   : > { %276 = vperm.xlu0 %689, %v257_v7   ;;  %266 = vperm.xlu1 %690, %v255_v8   ;;  %s478_s26 = sshll.u32 %s475_s16, 4  ;;  %s712_s12 = scalar_lea.hbm %s1019_s5, 256  ;;  %s479_s26 = int_to_ptr.hbm [resolvable:$true] %s478_s26 }
  0x21   : > { %310 = vmatpush.bf16.msra.mxu0 %v301_v10  ;;  %s706_s22 = sshra.s32 %s479_s26, 4  ;;  %s707_s22 = int_to_ptr.hbm [resolvable:$true] %s706_s22 }
  0x22   : > { %351 = vperm.xlu2 %691, %v335_v34   ;;  %s708_s27 = scalar_lea.hbm %s707_s22, 64  ;;  %p713_p4 = scmp.lt.s32.totalorder %s707_s22, %s1019_s5 }
  0x23   : > { %p709_p0 = scmp.ne.s32.totalorder %s707_s22, %s708_s27  ;;  %p714_p5 = scmp.lt.s32.totalorder %s712_s12, %s708_s27 }
  0x24   : > { %576 = vmatmul.msk.bf16.vlgmr.msra.gmra.mxu0 %vm289_vm2, %v603_v11 }
  0x25   : > { %p710_p1 = pnand %p709_p0, %p874_p3  ;;  %p715_p6 = por %p714_p5, %p713_p4 }
  0x27   : > { %p711_p2 = pneg %p710_p1 }
  0x28   : > { %356 = vperm.xlu0 %689, %v336_v12   ;;  %361 = vperm.xlu1 %690, %v337_v13  }
  0x29   : > { %p716_p7 = pnand %p715_p6, %p711_p2 }
  0x2a   : > { %366 = vperm.xlu2 %691, %v338_v40  }
  0x30   : > { %371 = vperm.xlu0 %689, %v339_v14   ;;  %376 = vperm.xlu1 %690, %v340_v15  }
  0x32   : > { %381 = vperm.xlu2 %691, %v341_v41  }
  0x34   : > { %577 = vmatmul.msk.bf16.gmra.mxu0 %vm289_vm2, %v604_v16 }
  0x74   : > { %v347_v43 = vpop.permute.xlu2 %346 }
  0x7c   : > { %v352_v44 = vpop.permute.xlu2 %351 }
  0x84   : > { %v367_v49 = vpop.permute.xlu2 %366 }
  0x8a   : > { %v272_v19 = vpop.permute.xlu0 %271  ;;  %v262_v20 = vpop.permute.xlu1 %261 }
  0x8c   : > { %v382_v62 = vpop.permute.xlu2 %381 }
  0x92   : > { %v277_v23 = vpop.permute.xlu0 %276  ;;  %v267_v25 = vpop.permute.xlu1 %266 }
  0x9a   : > { %v362_v45 = vpop.permute.xlu1 %361  ;;  %v357_v50 = vpop.permute.xlu0 %356 }
  0xa1   : > { %v312_v17 = vpop.f32.mrf.mxu0 }
  0xa2   : > { %v313_v29 = vadd.f32 %v312_v17, %v262_v20  ;;  %v377_v52 = vpop.permute.xlu1 %376  ;;  %v372_v7 = vpop.permute.xlu0 %371 }
  0xa4   : > { %v322_v35 = vmax.f32 %v313_v29, 0.0 }
  0xa9   : > { %v314_v18 = vpop.f32.mrf.mxu0 }
  0xaa   : > { %v315_v27 = vadd.f32 %v314_v18, %v267_v25 }
  0xac   : > { %v323_v32 = vmax.f32 %v315_v27, 0.0 }
  0xae   : > { %v342_v36 = vpack.c.bf16 %v323_v32, %v322_v35 }
  0xb1   : > { %v317_v21 = vpop.f32.mrf.mxu0 }
  0xb2   : > { %v318_v24 = vadd.f32 %v317_v21, %v272_v19 }
  0xb4   : > { %v324_v30 = vmax.f32 %v318_v24, 0.0 }
  0xb9   : > { %v319_v26 = vpop.f32.mrf.mxu0 }
  0xba   : > { %v320_v28 = vadd.f32 %v319_v26, %v277_v23 }
  0xbc   : > { %v325_v31 = vmax.f32 %v320_v28, 0.0 }
  0xbe   : > { %v343_v33 = vpack.c.bf16 %v325_v31, %v324_v30 }
  0xc0   : > { %423 = vmatpush.bf16.msra.mxu1 %v343_v33  ;;  %609 = vmatpush.bf16.msra.mxu2 %v343_v33 }
  0xc1   : > { %610 = vmatpush.bf16.msra.mxu3 %v343_v33 }
  0xc4   : > { %424 = vmatpush.bf16.msra.mxu1 %v342_v36  ;;  %611 = vmatpush.bf16.msra.mxu2 %v342_v36 }
  0xc5   : > { %612 = vmatpush.bf16.msra.mxu3 %v342_v36 }
  0xc7   : > { %594 = vmatmul.msk.bf16.vlgmr.msra.gmra.mxu1 %vm404_vm3, %v605_v37  ;;  %595 = vmatmul.msk.bf16.vlgmr.msra.gmra.mxu2 %vm404_vm3, %v606_v38 }
  0xc8   : > { %597 = vmatmul.msk.bf16.vlgmr.msra.gmra.mxu3 %vm404_vm3, %v608_v39 }
  0xd7   : > { %596 = vmatmul.msk.bf16.gmra.mxu2 %vm404_vm3, %v607_v42 }
 0x144   : > { %v426_v46 = vpop.f32.mrf.mxu1 }
 0x145   : > { %v427_v47 = vadd.f32 %v426_v46, %v347_v43 }
 0x147   : > { %v446_v48 = vmax.f32 %v427_v47, 0.0 }
 0x149   : > { %454 = vst [vmem:[%s958_s9] sm:$0xff] %v446_v48 }
 0x14a   : > { %v431_v51 = vpop.f32.mrf.mxu2 }
 0x14b   : > { %v432_v53 = vadd.f32 %v431_v51, %v357_v50  ;;  %v441_v54 = vpop.f32.mrf.mxu3 }
 0x14c   : > { %v442_v55 = vadd.f32 %v441_v54, %v377_v52  ;;  %v428_v56 = vpop.f32.mrf.mxu1 }
 0x14d   : > { %v448_v57 = vmax.f32 %v432_v53, 0.0  ;;  %v429_v58 = vadd.f32 %v428_v56, %v352_v44 }
 0x14e   : > { %v452_v59 = vmax.f32 %v442_v55, 0.0 }
 0x14f   : > { %456 = vst [vmem:[%s958_s9 + $0x10] sm:$0xff] %v448_v57  ;;  %v447_v60 = vmax.f32 %v429_v58, 0.0 }
 0x150   : > { %460 = vst [vmem:[%s958_s9 + $0x30] sm:$0xff] %v452_v59 }
 0x151   : > { %455 = vst [vmem:[%s958_s9 + $0x8] sm:$0xff] %v447_v60 }
 0x152   : > { %v433_v61 = vpop.f32.mrf.mxu2 }
 0x153   : > { %v434_v63 = vadd.f32 %v433_v61, %v362_v45  ;;  %v443_v0 = vpop.f32.mrf.mxu3 }
 0x154   : > { %v444_v1 = vadd.f32 %v443_v0, %v382_v62 }
 0x155   : > { %v449_v2 = vmax.f32 %v434_v63, 0.0 }
 0x156   : > { %v453_v3 = vmax.f32 %v444_v1, 0.0 }
 0x157   : > { %457 = vst [vmem:[%s958_s9 + $0x18] sm:$0xff] %v449_v2 }
 0x158   : > { %461 = vst [vmem:[%s958_s9 + $0x38] sm:$0xff] %v453_v3 }
 0x15a   : > { %v436_v4 = vpop.f32.mrf.mxu2 }
 0x15b   : > { %v437_v5 = vadd.f32 %v436_v4, %v367_v49 }
 0x15d   : > { %v450_v6 = vmax.f32 %v437_v5, 0.0 }
 0x15f   : > { %458 = vst [vmem:[%s958_s9 + $0x20] sm:$0xff] %v450_v6 }
 0x162   : > { %v438_v8 = vpop.f32.mrf.mxu2 }
 0x163   : > { %v439_v9 = vadd.f32 %v438_v8, %v372_v7 }
 0x165   : > { %v451_v10 = vmax.f32 %v439_v9, 0.0 }
 0x167   : > { %459 = vst [vmem:[%s958_s9 + $0x28] sm:$0xff] %v451_v10 }
 0x168   : > { %719 = shalt.err (!%p716_p7)
}
 0x169   : > { %s790_s30 = smov 128   ;;  %s791_s9 = smov 256  }
 0x16a   : > { %s792_s15 = smov 8  }
 0x16b   : > { %613 = dma.vmem_to_hbm [thread:$0]  (%p874_p3), %s477_s17, 1024, %s479_s26, %s463_s21, %s790_s30, %s791_s9, %s792_s15  }
 0x16c PF: > { %p619_p9 = scmp.ge.s32.totalorder %s786_s25, 2  ;;  %s493_s16 = sand.u32 1, %s758_s18  }
 0x16d   : > { %s494_s22 = scalar_lea.sflag [#allocation3], %s493_s16 }
 0x16e   : > { %p616_p10 = pnand %p619_p9, %p883_p8 }
 0x170   : > { %p617_p11 = pneg %p616_p10 }
 0x172   : > { %753 = dma.done.wait (%p617_p11), %s494_s22, 1024  }
 0x173   : > { %755 = vsyncadd (%p617_p11), %s494_s22, 4294966272  ;;  %s18_s25 = sadd.s32 1, %s786_s25   ;;  %s1022_s18 = smov %s762_s19 }
 0x174   : > { %p15_p12 = scmp.ge.s32.totalorder %s18_s25, 6   ;;  %s1023_s19 = smov %s766_s20 }
 0x175   : > { %s1024_s20 = smov %s892_s11  ;;  %s1025_s21 = smov %s778_s23 }
 0x176   : > { %s1026_s22 = smov %s782_s24  ;;  %s1027_s23 = smov %s1030_s28 }
 0x177   : > { %s1028_s24 = smov %s1034_s29  ;;  %17 = sbr.rel (!%p15_p12) target bundleno = 5 (0x5), region = 75 }
 0x17c   :  { %500 = vsyncpa [#allocation3], 1 }
 0x17d   :  { %502 = vsyncpa [#allocation3 + $0x1], 1 }

// kernel: tpu_custom_call.1
= control target key start
LH: loop header
LB: loop body
LE: loop exit
PB: predicated region body
PF: predicated region fallthrough
CT: control target
= control target key end

     0   :  { %10 = vsyncpa [#allocation3], 0  ;;  %s1014_s0 = inlined_call_operand.vmem [shape: f32[2,3,256], index: 0, kind: input, shape index: {}]   ;;  %s1015_s1 = inlined_call_operand.vmem [shape: bf16[32,3], index: 1, kind: input, shape index: {}]   ;;  %s1016_s2 = inlined_call_operand.vmem [shape: f32[32,1], index: 2, kind: input, shape index: {}]   ;;  %s1017_s3 = inlined_call_operand.vmem [shape: bf16[64,32], index: 3, kind: input, shape index: {}]   ;;  %s1018_s4 = inlined_call_operand.vmem [shape: f32[64,1], index: 4, kind: input, shape index: {}]   ;;  %s1019_s5 = inlined_call_operand.hbm [shape: f32[2,64,256], index: 5, kind: output, shape index: {}]  }
   0x1   :  { %12 = vsyncpa [#allocation3 + $0x1], 0  ;;  %s823_s18 = smov 0   ;;  %s825_s19 = smov 0  }
   0x2   :  { %s827_s20 = smov 0   ;;  %s829_s21 = smov 0  }
   0x3   :  { %s831_s22 = smov 0   ;;  %s833_s23 = smov 0  }
   0x4   :  { %s835_s24 = smov 0   ;;  %s837_s25 = smov 0  }
   0x5 LB: > { %s560_s26 = sadd.s32 4294967295, %s786_s25   ;;  %s561_s27 = sadd.s32 4294967294, %s786_s25   ;;  %s786_s25 = sphi %s837_s25, %s18_s25   ;;  %s782_s24 = sphi %s835_s24, %s1028_s24   ;;  %s778_s23 = sphi %s833_s23, %s1027_s23   ;;  %s774_s22 = sphi %s831_s22, %s1026_s22   ;;  %s770_s21 = sphi %s829_s21, %s1025_s21   ;;  %s766_s20 = sphi %s827_s20, %s1024_s20   ;;  %s762_s19 = sphi %s825_s19, %s1023_s19   ;;  %s758_s18 = sphi %s823_s18, %s1022_s18  }
   0x6   : > { %s27_s28 = sadd.s32 1, %s778_s23  ;;  %s30_s29 = sadd.s32 1, %s782_s24 }
   0x7   : > { %p28_p0 = scmp.ge.s32.totalorder %s27_s28, 2  ;;  %p161_p1 = scmp.ne.s32.totalorder %s766_s20, %s762_s19 }
   0x8   : > { %p162_p2 = scmp.eq.s32.totalorder %s560_s26, 3  ;;  %p167_p5 = scmp.ne.s32.totalorder %s762_s19, %s758_s18 }
   0x9   : > { %s1030_s28 = smov (%p28_p0, %s27_s28), 0  ;;  %s1032_s29 = smov (!%p28_p0, %s30_s29), %s782_s24 }
   0xa   : > { %s147_s30 = ssub.s32 %s778_s23, %s1030_s28  ;;  %p874_p3 = por %p162_p2, %p161_p1 }
   0xb   : > { %p32_p4 = scmp.ge.s32.totalorder %s1032_s29, 2  ;;  %p168_p6 = scmp.eq.s32.totalorder %s561_s27, 3 }
   0xc   : > { %p564_p7 = scmp.ge.s32.totalorder %s786_s25, 1  ;;  %p209_p9 = scmp.lt.s32.totalorder %s786_s25, 5 }
   0xd   : > { %s1034_s29 = smov (%p32_p4, %s1032_s29), 0  ;;  %p883_p8 = por %p168_p6, %p167_p5 }
   0xe   : > { %s146_s8 = ssub.s32 %s782_s24, %s1034_s29  ;;  %s151_s9 = sadd.s32 1, %s766_s20 }
   0xf   : > { %s148_s10 = sor.u32 %s147_s30, %s146_s8  ;;  %p210_p10 = pnand %p564_p7, %p209_p9 }
  0x10   : > { %p149_p11 = scmp.eq.s32.totalorder %s148_s10, 0  ;;  %p240_p12 = scmp.lt.s32.totalorder (!%p210_p10), %s774_s22, 1 }
  0x11   : > { %213 = sbr.rel (%p210_p10) target bundleno = 364 (0x16c), region = 40  ;;  %p242_p13 = scmp.lt.s32.totalorder (!%p210_p10), %s770_s21, 1 }
  0x12   : > { %s892_s11 = scalar_select %p149_p11, %s766_s20, %s151_s9  }
  0x16   : > { %v256_v0 = vld [vmem:[%s1016_s2 + $0x10] sm:$0xff]  ;;  %v254_v1 = vld [vmem:[%s1016_s2] sm:$0xff]  ;;  %s241_s16 = scalar_select %p240_p12, %s774_s22, 1  ;;  %vm296_vm0 = vcmask 1040384   ;;  %v788_v2 = vmov 0   ;;  %vm297_vm1 = vcmask 1041408  }
  0x17   : > { %689 = vset.pattern.permute.xlu0 %v788_v2  ;;  %690 = vset.pattern.permute.xlu1 %v788_v2  ;;  %s243_s17 = scalar_select %p242_p13, %s770_s21, 1  ;;  %v789_v3 = vmov 65535   ;;  %v257_v7 = vld [vmem:[%s1016_s2 + $0x18] sm:$0xff]  ;;  %v255_v8 = vld [vmem:[%s1016_s2 + $0x8] sm:$0xff]  ;;  %v603_v11 = vld [vmem:[%s1015_s1] sm:$0xff]  ;;  %vm289_vm2 = vcmask 23552  }
  0x18   : > { %271 = vperm.xlu0 %689, %v256_v0   ;;  %261 = vperm.xlu1 %690, %v254_v1   ;;  %s566_s26 = sshll.u32 %s241_s16, 1  ;;  %v298_v4 = vsel %vm296_vm0, 4294967295, %v789_v3  ;;  %v336_v12 = vld [vmem:[%s1018_s4 + $0x10] sm:$0xff]  ;;  %v337_v13 = vld [vmem:[%s1018_s4 + $0x18] sm:$0xff]  ;;  %v339_v14 = vld [vmem:[%s1018_s4 + $0x28] sm:$0xff]  ;;  %vm404_vm3 = vcmask 261120  }
  0x19   : > { %691 = vset.pattern.permute.xlu2 %v788_v2  ;;  %s245_s27 = sadd.s32 %s566_s26, %s243_s17  ;;  %v299_v6 = vsel %vm297_vm1, %v298_v4, 0  ;;  %v340_v15 = vld [vmem:[%s1018_s4 + $0x30] sm:$0xff]  ;;  %v604_v16 = vld [vmem:[%s1015_s1 + $0x8] sm:$0xff]  ;;  %v334_v22 = vld [vmem:[%s1018_s4] sm:$0xff] }
  0x1a   : > { %s567_s30 = sshll.u32 %s245_s27, 2  ;;  %346 = vperm.xlu2 %691, %v334_v22   ;;  %v335_v34 = vld [vmem:[%s1018_s4 + $0x8] sm:$0xff]  ;;  %v605_v37 = vld [vmem:[%s1017_s3] sm:$0xff]  ;;  %v608_v39 = vld [vmem:[%s1017_s3 + $0x18] sm:$0xff] }
  0x1b   : > { %s247_s10 = scalar_lea.vmem %s1014_s0, %s567_s30  ;;  %v606_v38 = vld [vmem:[%s1017_s3 + $0x8] sm:$0xff]  ;;  %v338_v40 = vld [vmem:[%s1018_s4 + $0x20] sm:$0xff]  ;;  %v341_v41 = vld [vmem:[%s1018_s4 + $0x38] sm:$0xff]  ;;  %s237_s30 = sand.u32 1, %s762_s19  }
  0x1c   : > { %v249_v5 = vld [vmem:[%s247_s10] sm:$0x7]  ;;  %v607_v42 = vld [vmem:[%s1017_s3 + $0x10] sm:$0xff]  ;;  %s565_s8 = sshll.u32 %s237_s30, 6  ;;  %s599_s10 = sshll.u32 %s774_s22, 4 }
  0x1d   : > { %v258_v9 = vpack.c.bf16 %v249_v5, %v249_v5  ;;  %s958_s9 = scalar_lea.vmem [#allocation2], %s565_s8  ;;  %s473_s12 = sadd.s32 %s770_s21, %s599_s10 }
  0x1e   : > { %s600_s13 = sshll.u32 %s473_s12, 3  ;;  %s476_s17 = sshll.u32 %s958_s9, 4  ;;  %s477_s17 = int_to_ptr.vmem [resolvable:$true] %s476_s17 }
  0x1f   : > { %v301_v10 = vand.u32 %v299_v6, %v258_v9  ;;  %s475_s16 = scalar_lea.hbm %s1019_s5, %s600_s13  ;;  %s463_s21 = scalar_lea.sflag [#allocation3], %s237_s30 }
  0x20   : > { %276 = vperm.xlu0 %689, %v257_v7   ;;  %266 = vperm.xlu1 %690, %v255_v8   ;;  %s478_s26 = sshll.u32 %s475_s16, 4  ;;  %s712_s12 = scalar_lea.hbm %s1019_s5, 256  ;;  %s479_s26 = int_to_ptr.hbm [resolvable:$true] %s478_s26 }
  0x21   : > { %310 = vmatpush.bf16.msra.mxu0 %v301_v10  ;;  %s706_s22 = sshra.s32 %s479_s26, 4  ;;  %s707_s22 = int_to_ptr.hbm [resolvable:$true] %s706_s22 }
  0x22   : > { %351 = vperm.xlu2 %691, %v335_v34   ;;  %s708_s27 = scalar_lea.hbm %s707_s22, 64  ;;  %p713_p4 = scmp.lt.s32.totalorder %s707_s22, %s1019_s5 }
  0x23   : > { %p709_p0 = scmp.ne.s32.totalorder %s707_s22, %s708_s27  ;;  %p714_p5 = scmp.lt.s32.totalorder %s712_s12, %s708_s27 }
  0x24   : > { %576 = vmatmul.msk.bf16.vlgmr.msra.gmra.mxu0 %vm289_vm2, %v603_v11 }
  0x25   : > { %p710_p1 = pnand %p709_p0, %p874_p3  ;;  %p715_p6 = por %p714_p5, %p713_p4 }
  0x27   : > { %p711_p2 = pneg %p710_p1 }
  0x28   : > { %356 = vperm.xlu0 %689, %v336_v12   ;;  %361 = vperm.xlu1 %690, %v337_v13  }
  0x29   : > { %p716_p7 = pnand %p715_p6, %p711_p2 }
  0x2a   : > { %366 = vperm.xlu2 %691, %v338_v40  }
  0x30   : > { %371 = vperm.xlu0 %689, %v339_v14   ;;  %376 = vperm.xlu1 %690, %v340_v15  }
  0x32   : > { %381 = vperm.xlu2 %691, %v341_v41  }
  0x34   : > { %577 = vmatmul.msk.bf16.gmra.mxu0 %vm289_vm2, %v604_v16 }
  0x74   : > { %v347_v43 = vpop.permute.xlu2 %346 }
  0x7c   : > { %v352_v44 = vpop.permute.xlu2 %351 }
  0x84   : > { %v367_v49 = vpop.permute.xlu2 %366 }
  0x8a   : > { %v272_v19 = vpop.permute.xlu0 %271  ;;  %v262_v20 = vpop.permute.xlu1 %261 }
  0x8c   : > { %v382_v62 = vpop.permute.xlu2 %381 }
  0x92   : > { %v277_v23 = vpop.permute.xlu0 %276  ;;  %v267_v25 = vpop.permute.xlu1 %266 }
  0x9a   : > { %v362_v45 = vpop.permute.xlu1 %361  ;;  %v357_v50 = vpop.permute.xlu0 %356 }
  0xa1   : > { %v312_v17 = vpop.f32.mrf.mxu0 }
  0xa2   : > { %v313_v29 = vadd.f32 %v312_v17, %v262_v20  ;;  %v377_v52 = vpop.permute.xlu1 %376  ;;  %v372_v7 = vpop.permute.xlu0 %371 }
  0xa4   : > { %v322_v35 = vmax.f32 %v313_v29, 0.0 }
  0xa9   : > { %v314_v18 = vpop.f32.mrf.mxu0 }
  0xaa   : > { %v315_v27 = vadd.f32 %v314_v18, %v267_v25 }
  0xac   : > { %v323_v32 = vmax.f32 %v315_v27, 0.0 }
  0xae   : > { %v342_v36 = vpack.c.bf16 %v323_v32, %v322_v35 }
  0xb1   : > { %v317_v21 = vpop.f32.mrf.mxu0 }
  0xb2   : > { %v318_v24 = vadd.f32 %v317_v21, %v272_v19 }
  0xb4   : > { %v324_v30 = vmax.f32 %v318_v24, 0.0 }
  0xb9   : > { %v319_v26 = vpop.f32.mrf.mxu0 }
  0xba   : > { %v320_v28 = vadd.f32 %v319_v26, %v277_v23 }
  0xbc   : > { %v325_v31 = vmax.f32 %v320_v28, 0.0 }
  0xbe   : > { %v343_v33 = vpack.c.bf16 %v325_v31, %v324_v30 }
  0xc0   : > { %423 = vmatpush.bf16.msra.mxu1 %v343_v33  ;;  %609 = vmatpush.bf16.msra.mxu2 %v343_v33 }
  0xc1   : > { %610 = vmatpush.bf16.msra.mxu3 %v343_v33 }
  0xc4   : > { %424 = vmatpush.bf16.msra.mxu1 %v342_v36  ;;  %611 = vmatpush.bf16.msra.mxu2 %v342_v36 }
  0xc5   : > { %612 = vmatpush.bf16.msra.mxu3 %v342_v36 }
  0xc7   : > { %594 = vmatmul.msk.bf16.vlgmr.msra.gmra.mxu1 %vm404_vm3, %v605_v37  ;;  %595 = vmatmul.msk.bf16.vlgmr.msra.gmra.mxu2 %vm404_vm3, %v606_v38 }
  0xc8   : > { %597 = vmatmul.msk.bf16.vlgmr.msra.gmra.mxu3 %vm404_vm3, %v608_v39 }
  0xd7   : > { %596 = vmatmul.msk.bf16.gmra.mxu2 %vm404_vm3, %v607_v42 }
 0x144   : > { %v426_v46 = vpop.f32.mrf.mxu1 }
 0x145   : > { %v427_v47 = vadd.f32 %v426_v46, %v347_v43 }
 0x147   : > { %v446_v48 = vmax.f32 %v427_v47, 0.0 }
 0x149   : > { %454 = vst [vmem:[%s958_s9] sm:$0xff] %v446_v48 }
 0x14a   : > { %v431_v51 = vpop.f32.mrf.mxu2 }
 0x14b   : > { %v432_v53 = vadd.f32 %v431_v51, %v357_v50  ;;  %v441_v54 = vpop.f32.mrf.mxu3 }
 0x14c   : > { %v442_v55 = vadd.f32 %v441_v54, %v377_v52  ;;  %v428_v56 = vpop.f32.mrf.mxu1 }
 0x14d   : > { %v448_v57 = vmax.f32 %v432_v53, 0.0  ;;  %v429_v58 = vadd.f32 %v428_v56, %v352_v44 }
 0x14e   : > { %v452_v59 = vmax.f32 %v442_v55, 0.0 }
 0x14f   : > { %456 = vst [vmem:[%s958_s9 + $0x10] sm:$0xff] %v448_v57  ;;  %v447_v60 = vmax.f32 %v429_v58, 0.0 }
 0x150   : > { %460 = vst [vmem:[%s958_s9 + $0x30] sm:$0xff] %v452_v59 }
 0x151   : > { %455 = vst [vmem:[%s958_s9 + $0x8] sm:$0xff] %v447_v60 }
 0x152   : > { %v433_v61 = vpop.f32.mrf.mxu2 }
 0x153   : > { %v434_v63 = vadd.f32 %v433_v61, %v362_v45  ;;  %v443_v0 = vpop.f32.mrf.mxu3 }
 0x154   : > { %v444_v1 = vadd.f32 %v443_v0, %v382_v62 }
 0x155   : > { %v449_v2 = vmax.f32 %v434_v63, 0.0 }
 0x156   : > { %v453_v3 = vmax.f32 %v444_v1, 0.0 }
 0x157   : > { %457 = vst [vmem:[%s958_s9 + $0x18] sm:$0xff] %v449_v2 }
 0x158   : > { %461 = vst [vmem:[%s958_s9 + $0x38] sm:$0xff] %v453_v3 }
 0x15a   : > { %v436_v4 = vpop.f32.mrf.mxu2 }
 0x15b   : > { %v437_v5 = vadd.f32 %v436_v4, %v367_v49 }
 0x15d   : > { %v450_v6 = vmax.f32 %v437_v5, 0.0 }
 0x15f   : > { %458 = vst [vmem:[%s958_s9 + $0x20] sm:$0xff] %v450_v6 }
 0x162   : > { %v438_v8 = vpop.f32.mrf.mxu2 }
 0x163   : > { %v439_v9 = vadd.f32 %v438_v8, %v372_v7 }
 0x165   : > { %v451_v10 = vmax.f32 %v439_v9, 0.0 }
 0x167   : > { %459 = vst [vmem:[%s958_s9 + $0x28] sm:$0xff] %v451_v10 }
 0x168   : > { %719 = shalt.err (!%p716_p7)
}
 0x169   : > { %s790_s30 = smov 128   ;;  %s791_s9 = smov 256  }
 0x16a   : > { %s792_s15 = smov 8  }
 0x16b   : > { %613 = dma.vmem_to_hbm [thread:$0]  (%p874_p3), %s477_s17, 1024, %s479_s26, %s463_s21, %s790_s30, %s791_s9, %s792_s15  }
 0x16c PF: > { %p619_p9 = scmp.ge.s32.totalorder %s786_s25, 2  ;;  %s493_s16 = sand.u32 1, %s758_s18  }
 0x16d   : > { %s494_s22 = scalar_lea.sflag [#allocation3], %s493_s16 }
 0x16e   : > { %p616_p10 = pnand %p619_p9, %p883_p8 }
 0x170   : > { %p617_p11 = pneg %p616_p10 }
 0x172   : > { %753 = dma.done.wait (%p617_p11), %s494_s22, 1024  }
 0x173   : > { %755 = vsyncadd (%p617_p11), %s494_s22, 4294966272  ;;  %s18_s25 = sadd.s32 1, %s786_s25   ;;  %s1022_s18 = smov %s762_s19 }
 0x174   : > { %p15_p12 = scmp.ge.s32.totalorder %s18_s25, 6   ;;  %s1023_s19 = smov %s766_s20 }
 0x175   : > { %s1024_s20 = smov %s892_s11  ;;  %s1025_s21 = smov %s778_s23 }
 0x176   : > { %s1026_s22 = smov %s782_s24  ;;  %s1027_s23 = smov %s1030_s28 }
 0x177   : > { %s1028_s24 = smov %s1034_s29  ;;  %17 = sbr.rel (!%p15_p12) target bundleno = 5 (0x5), region = 75 }
 0x17c   :  { %500 = vsyncpa [#allocation3], 1 }
 0x17d   :  { %502 = vsyncpa [#allocation3 + $0x1], 1 }

</bundles_post_ra>
